<compile_context>
chip_gen: v5e
topology: v5e:2x2
jax: 0.10.0
libtpu: 0.0.40
codegen_flags: <defaults>
</compile_context>

<pallas_src>
import jax
import jax.numpy as jnp
from jax.experimental import pallas as pl
from jax.experimental.pallas import tpu as pltpu

IN_F = 3              # fc1 input features (real, unpadded)
HID_PAD = 8           # 4 hidden units + 1 constant bias channel + zero pad
MAX_BLOCK_ROWS = 512  # cap on batch rows per grid step


def _round_up(n, m):
    return (n + m - 1) // m * m


def _choose_block_rows(B):
    """Batch rows per grid block: big enough to amortize per-step overhead,
    but >= 2 blocks when B allows it (keeps both v7x TensorCores busy)."""
    if B <= 8:
        return 8
    half = _round_up(-(-B // 2), 8)  # ceil(B/2), sublane-aligned
    return min(MAX_BLOCK_ROWS, half)


def mlp_kernel(x_ref, w1_ref, b1_ref, w2_ref, o_ref):
    # x_ref:  (TB, 3)        raw input rows (no padding column)
    # w1_ref: (3, HID_PAD)   fc1.weight^T, zero-padded along the hidden axis
    # b1_ref: (1, HID_PAD)   fc1.bias (+ 1.0 in the bias channel, col 4)
    # w2_ref: (1, HID_PAD)   fc2.weight (+ fc2.bias in the bias channel, col 4)
    # o_ref:  (TB, 1)
    x = x_ref[...]
    w1 = w1_ref[...]
    # fc1 + bias: K=3 contraction done as 3 broadcast multiply-adds on the VPU
    # (too small for the MXU to matter; keeps the lowering trivially simple).
    h = (b1_ref[...]
         + x[:, 0:1] * w1[0:1, :]
         + x[:, 1:2] * w1[1:2, :]
         + x[:, 2:3] * w1[2:3, :])
    h = jnp.maximum(h, 0.0)  # ReLU; relu(1) == 1 keeps the bias channel alive
    # fc2 (+ b2 via the bias channel): elementwise mul + lane reduction (XLU).
    o_ref[...] = jnp.sum(h * w2_ref[...], axis=-1, keepdims=True)


def pad_params(w1, b1, w2, b2):
    """Pad / bias-fold the fixed parameters ONCE (reused across every call)."""
    w1p = jnp.zeros((IN_F, HID_PAD), jnp.float32).at[:, :4].set(w1.T)
    b1p = jnp.zeros((1, HID_PAD), jnp.float32).at[0, :4].set(b1)
    b1p = b1p.at[0, 4].set(1.0)            # bias channel: h[:, 4] == relu(1) == 1
    w2p = jnp.zeros((1, HID_PAD), jnp.float32).at[0, :4].set(w2[0, :])
    w2p = w2p.at[0, 4].set(b2[0])          # fc2 bias picked up by the bias channel
    return w1p, b1p, w2p


@jax.jit
def mlp_forward(x, w1p, b1p, w2p):
    """x: (B, 3) float32. Returns (B, 1) float32, matching the PyTorch Model."""
    B = x.shape[0]
    tb = _choose_block_rows(B)
    Bp = _round_up(B, tb)
    nb = Bp // tb
    # Row-pad only when needed (zero rows are inert per-row and sliced off below).
    xp = x if Bp == B else jnp.pad(x, ((0, Bp - B), (0, 0)))

    out = pl.pallas_call(
        mlp_kernel,
        out_shape=jax.ShapeDtypeStruct((Bp, 1), jnp.float32),
        grid=(nb,),
        in_specs=[
            pl.BlockSpec((tb, IN_F), lambda i: (i, 0)),        # x rows, streamed
            pl.BlockSpec((IN_F, HID_PAD), lambda i: (0, 0)),   # weights: fetched once
            pl.BlockSpec((1, HID_PAD), lambda i: (0, 0)),
            pl.BlockSpec((1, HID_PAD), lambda i: (0, 0)),
        ],
        out_specs=pl.BlockSpec((tb, 1), lambda i: (i, 0)),     # narrow output, no 128-pad
        compiler_params=pltpu.CompilerParams(
            dimension_semantics=("parallel",),  # batch blocks shard across TCs (v7x)
            vmem_limit_bytes=8 << 20,           # double-buffered footprint ~1 MiB at tb=512
        ),
    )(xp, w1p, b1p, w2p)

    return out if Bp == B else out[:B]


if __name__ == "__main__":
    # Deterministic parameters exactly as in Model.initialize()
    w1 = jnp.array([[1.0, 2.0, 3.0],
                    [-4.0, -5.0, -6.0],
                    [7.0, 8.0, 9.0],
                    [-10.0, -11.0, -12.0]], dtype=jnp.float32)   # fc1.weight (4, 3)
    b1 = jnp.array([1.0, 2.0, 3.0, 4.0], dtype=jnp.float32)      # fc1.bias (4,)
    w2 = jnp.array([[1.0, 2.0, 3.0, 4.0]], dtype=jnp.float32)    # fc2.weight (1, 4)
    b2 = jnp.array([1.0], dtype=jnp.float32)                     # fc2.bias (1,)

    # Padded / bias-folded weights built once, outside the per-call path.
    w1p, b1p, w2p = jax.block_until_ready(pad_params(w1, b1, w2, b2))

    # Same input as the PyTorch script: x = [[1., 1., 1.]]
    x = jnp.array([[1.0, 1.0, 1.0]], dtype=jnp.float32)
    out = jax.block_until_ready(mlp_forward(x, w1p, b1p, w2p))
    # Reference: fc1 -> [7, -13, 27, -29]; relu -> [7, 0, 27, 0]; fc2 -> 89
    expected = jnp.array([[89.0]], dtype=jnp.float32)
    assert out.shape == (1, 1), out.shape
    assert jnp.allclose(out, expected, atol=1e-5), out

    # Larger batch (17 rows -> 2 grid blocks of 16 with row padding) vs pure JAX.
    key = jax.random.PRNGKey(0)
    xb = jax.random.normal(key, (17, 3), dtype=jnp.float32)
    out_b = jax.block_until_ready(mlp_forward(xb, w1p, b1p, w2p))
    ref_b = jnp.maximum(xb @ w1.T + b1, 0.0) @ w2.T + b2
    assert out_b.shape == (17, 1), out_b.shape
    assert jnp.allclose(out_b, ref_b, atol=1e-4), (out_b, ref_b)

    print("KERNEL_OK")
</pallas_src>

<mosaic_0001>
module attributes {stable_mosaic.version = 11 : i64} {
  func.func @mlp_kernel(%arg0: i32, %arg1: memref<8x3xf32, #tpu.memory_space<vmem>>, %arg2: memref<3x8xf32, #tpu.memory_space<vmem>>, %arg3: memref<1x8xf32, #tpu.memory_space<vmem>>, %arg4: memref<1x8xf32, #tpu.memory_space<vmem>>, %arg5: memref<8x1xf32, #tpu.memory_space<vmem>>) attributes {dimension_semantics = [#tpu.dimension_semantics<parallel>], iteration_bounds = array<i64: 1>, scalar_prefetch = 0 : i64, scratch_operands = 0 : i64, tpu.core_type = #tpu.core_type<tc>, window_params = [{transform_indices = @transform_0, window_bounds = array<i64: 8, 3>}, {pipeline_mode = #tpu.pipeline_mode<synchronous>, transform_indices = @transform_1, window_bounds = array<i64: 3, 8>}, {pipeline_mode = #tpu.pipeline_mode<synchronous>, transform_indices = @transform_2, window_bounds = array<i64: 1, 8>}, {pipeline_mode = #tpu.pipeline_mode<synchronous>, transform_indices = @transform_3, window_bounds = array<i64: 1, 8>}, {transform_indices = @transform_4, window_bounds = array<i64: 8, 1>}]} {
    %c0 = arith.constant 0 : index
    %c0_0 = arith.constant 0 : index
    %0 = vector.load %arg1[%c0, %c0_0] : memref<8x3xf32, #tpu.memory_space<vmem>>, vector<8x3xf32>
    %c0_1 = arith.constant 0 : index
    %c0_2 = arith.constant 0 : index
    %1 = vector.load %arg2[%c0_1, %c0_2] : memref<3x8xf32, #tpu.memory_space<vmem>>, vector<3x8xf32>
    %c0_3 = arith.constant 0 : index
    %c0_4 = arith.constant 0 : index
    %2 = vector.load %arg3[%c0_3, %c0_4] : memref<1x8xf32, #tpu.memory_space<vmem>>, vector<1x8xf32>
    %3 = vector.extract_strided_slice %0 {offsets = [0, 0], sizes = [8, 1], strides = [1, 1]} : vector<8x3xf32> to vector<8x1xf32>
    %4 = vector.extract_strided_slice %1 {offsets = [0, 0], sizes = [1, 8], strides = [1, 1]} : vector<3x8xf32> to vector<1x8xf32>
    %5 = vector.broadcast %3 : vector<8x1xf32> to vector<8x8xf32>
    %6 = vector.broadcast %4 : vector<1x8xf32> to vector<8x8xf32>
    %7 = arith.mulf %5, %6 : vector<8x8xf32>
    %8 = vector.broadcast %2 : vector<1x8xf32> to vector<8x8xf32>
    %9 = arith.addf %8, %7 : vector<8x8xf32>
    %10 = vector.extract_strided_slice %0 {offsets = [0, 1], sizes = [8, 1], strides = [1, 1]} : vector<8x3xf32> to vector<8x1xf32>
    %11 = vector.extract_strided_slice %1 {offsets = [1, 0], sizes = [1, 8], strides = [1, 1]} : vector<3x8xf32> to vector<1x8xf32>
    %12 = vector.broadcast %10 : vector<8x1xf32> to vector<8x8xf32>
    %13 = vector.broadcast %11 : vector<1x8xf32> to vector<8x8xf32>
    %14 = arith.mulf %12, %13 : vector<8x8xf32>
    %15 = arith.addf %9, %14 : vector<8x8xf32>
    %16 = vector.extract_strided_slice %0 {offsets = [0, 2], sizes = [8, 1], strides = [1, 1]} : vector<8x3xf32> to vector<8x1xf32>
    %17 = vector.extract_strided_slice %1 {offsets = [2, 0], sizes = [1, 8], strides = [1, 1]} : vector<3x8xf32> to vector<1x8xf32>
    %18 = vector.broadcast %16 : vector<8x1xf32> to vector<8x8xf32>
    %19 = vector.broadcast %17 : vector<1x8xf32> to vector<8x8xf32>
    %20 = arith.mulf %18, %19 : vector<8x8xf32>
    %21 = arith.addf %15, %20 : vector<8x8xf32>
    %cst = arith.constant 0.000000e+00 : f32
    %22 = vector.broadcast %cst : f32 to vector<8x8xf32>
    %23 = arith.maximumf %21, %22 : vector<8x8xf32>
    %c0_5 = arith.constant 0 : index
    %c0_6 = arith.constant 0 : index
    %24 = vector.load %arg4[%c0_5, %c0_6] : memref<1x8xf32, #tpu.memory_space<vmem>>, vector<1x8xf32>
    %25 = vector.broadcast %24 : vector<1x8xf32> to vector<8x8xf32>
    %26 = arith.mulf %23, %25 : vector<8x8xf32>
    %cst_7 = arith.constant dense<0.000000e+00> : vector<8xf32>
    %27 = vector.multi_reduction <add>, %26, %cst_7 [1] : vector<8x8xf32> to vector<8xf32>
    %28 = vector.shape_cast %27 : vector<8xf32> to vector<8x1xf32>
    %c0_8 = arith.constant 0 : index
    %c0_9 = arith.constant 0 : index
    %29 = vector.load %arg5[%c0_8, %c0_9] : memref<8x1xf32, #tpu.memory_space<vmem>>, vector<8x1xf32>
    tpu.vector_store %arg5[%c0_8, %c0_9], %28 {strides = array<i32>} : memref<8x1xf32, #tpu.memory_space<vmem>>, vector<8x1xf32>,
    return
  }
  func.func @transform_0(%arg0: i32) -> (i32, i32) {
    %c0_i32 = arith.constant 0 : i32
    %c0_i32_0 = arith.constant 0 : i32
    return %arg0, %c0_i32 : i32, i32
  }
  func.func @transform_1(%arg0: i32) -> (i32, i32) {
    %c0_i32 = arith.constant 0 : i32
    %c0_i32_0 = arith.constant 0 : i32
    %c0_i32_1 = arith.constant 0 : i32
    return %c0_i32, %c0_i32_0 : i32, i32
  }
  func.func @transform_2(%arg0: i32) -> (i32, i32) {
    %c0_i32 = arith.constant 0 : i32
    %c0_i32_0 = arith.constant 0 : i32
    %c0_i32_1 = arith.constant 0 : i32
    return %c0_i32, %c0_i32_0 : i32, i32
  }
  func.func @transform_3(%arg0: i32) -> (i32, i32) {
    %c0_i32 = arith.constant 0 : i32
    %c0_i32_0 = arith.constant 0 : i32
    %c0_i32_1 = arith.constant 0 : i32
    return %c0_i32, %c0_i32_0 : i32, i32
  }
  func.func @transform_4(%arg0: i32) -> (i32, i32) {
    %c0_i32 = arith.constant 0 : i32
    %c0_i32_0 = arith.constant 0 : i32
    return %arg0, %c0_i32 : i32, i32
  }
}

</mosaic_0001>

<bundles_post_ra>
// kernel: mlp_forward.1
= control target key start
LH: loop header
LB: loop body
LE: loop exit
PB: predicated region body
PF: predicated region fallthrough
CT: control target
= control target key end

     0   :  { %v70_v0 = vmov 0   ;;  %v71_v2 = vmov 2   ;;  %v72_v3 = vmov 1   ;;  %vm51_vm0 = vcmask 64512   ;;  %s113_s0 = inlined_call_operand.vmem [shape: f32[8,3], index: 0, kind: input, shape index: {}]   ;;  %s114_s2 = inlined_call_operand.vmem [shape: f32[1,8], index: 2, kind: input, shape index: {}]   ;;  %s115_s3 = inlined_call_operand.vmem [shape: f32[1,8], index: 3, kind: input, shape index: {}]   ;;  %s116_s1 = inlined_call_operand.vmem [shape: f32[3,8], index: 1, kind: input, shape index: {}]   ;;  %s117_s4 = inlined_call_operand.vmem [shape: f32[8,1], index: 4, kind: output, shape index: {}]  }
   0x1   :  { %64 = vset.pattern.permute.xlu0 %v70_v0  ;;  %v17_v1 = vld [vmem:[%s113_s0] sm:$0xff]  ;;  %66 = vset.pattern.permute.xlu1 %v71_v2  ;;  %vm55_vm1 = vcmask 7168  }
   0x2   :  { %22 = vperm.xlu0 %64, %v17_v1   ;;  %39 = vperm.xlu1 %66, %v17_v1   ;;  %v18_v4 = vld [vmem:[%s116_s1] sm:$0x7] }
   0x3   :  { %v25_v6 = vperm.slane %v18_v4, 0  ;;  %v68_v7 = vld [vmem:[%s114_s2] ss:$0 sm:$0xff]  ;;  %v35_v9 = vperm.slane %v18_v4, 1  ;;  %v42_v10 = vperm.slane %v18_v4, 2 }
   0x4   :  { %v69_v18 = vld [vmem:[%s115_s3] ss:$0 sm:$0xff] }
   0xa   :  { %65 = vset.pattern.permute.xlu0 %v72_v3 }
   0xb   :  { %32 = vperm.xlu0 %65, %v17_v1  }
  0x13   :  { %67 = vset.pattern.permute.xlu0 %v71_v2 }
  0x74   :  { %v23_v5 = vpop.permute.xlu0 %22  ;;  %v40_v11 = vpop.permute.xlu1 %39 }
  0x75   :  { %v26_v8 = vmul.f32 %v25_v6, %v23_v5  ;;  %v43_v15 = vmul.f32 %v42_v10, %v40_v11 }
  0x77   :  { %v30_v13 = vadd.f32 %v68_v7, %v26_v8 }
  0x7d   :  { %v33_v12 = vpop.permute.xlu0 %32 }
  0x7e   :  { %v36_v14 = vmul.f32 %v35_v9, %v33_v12 }
  0x80   :  { %v37_v16 = vadd.f32 %v36_v14, %v30_v13 }
  0x82   :  { %v44_v17 = vadd.f32 %v43_v15, %v37_v16 }
  0x84   :  { %v45_v19 = vmax.f32 %v44_v17, 0.0 }
  0x86   :  { %v50_v20 = vmul.f32 %v69_v18, %v45_v19 }
  0x88   :  { %v52_v21 = vsel %vm51_vm0, %v50_v20, 0.0 }
  0x89   :  { %53 = vadd.xlane.f32.xlu1 %v52_v21 }
  0xfc   :  { %v54_v22 = vpop.xlane.xlu1 %53 }
  0xfd   :  { %56 = vst.msk [vmem:[%s117_s4] sm:$0xff] %vm55_vm1, %v54_v22 }

</bundles_post_ra>
